<compile_context>
chip_gen: v7x
topology: tpu7x:2x2x1
jax: 0.10.0
libtpu: 0.0.40
codegen_flags: <defaults>
</compile_context>

<pallas_src>
import jax
import jax.numpy as jnp
from jax.experimental import pallas as pl
from jax.experimental.pallas import tpu as pltpu


LANE_PAD = 128        # pad the class/output dim to one full lane width
_NEG_BIG = -1e30      # "minus infinity" for padded logits (exp underflows to 0)
_SUBLANE = 16         # bf16 sublane packing for the x tile (also satisfies f32's 8)


def _round_up(x, m):
    return ((x + m - 1) // m) * m


def _ceil_div(a, b):
    return -(-a // b)


def linear_softmax_kernel(x_ref, wt_ref, b_ref, o_ref):
    # x_ref:  (TB, 784)        bf16 flattened input batch tile (pipelined)
    # wt_ref: (784, LANE_PAD)  bf16 transposed + zero-padded weight (VMEM resident)
    # b_ref:  (1, LANE_PAD)    f32 bias, padded slots = -1e30 (VMEM resident)
    # o_ref:  (TB, LANE_PAD)   f32 softmax probabilities (padded lanes exactly 0)
    logits = jnp.dot(
        x_ref[...], wt_ref[...], preferred_element_type=jnp.float32
    ) + b_ref[...]
    # Numerically stable softmax along dim=1 (matches torch.softmax(..., dim=1));
    # padded columns have logits ~ -1e30 so exp(logit - m) == 0 exactly and they
    # do not contribute to the denominator.
    m = jnp.max(logits, axis=1, keepdims=True)
    e = jnp.exp(logits - m)
    denom = jnp.sum(e, axis=1, keepdims=True)
    inv = pl.reciprocal(denom, approx=True)   # EUP vrcp, frees the VALU path
    o_ref[...] = (e * inv).astype(o_ref.dtype)


def prepare_linear_params(weight, bias, lane_pad=LANE_PAD):
    """One-time parameter prep (keep OUT of the per-call hot path).

    weight: (out_dim, in_dim)  PyTorch nn.Linear layout
    bias:   (out_dim,)
    returns wt_padded (in_dim, lane_pad) bf16, bias_padded (1, lane_pad) f32, out_dim
    """
    out_dim, in_dim = weight.shape
    assert out_dim <= lane_pad
    wt_padded = jnp.zeros((in_dim, lane_pad), dtype=jnp.bfloat16)
    wt_padded = wt_padded.at[:, :out_dim].set(weight.T.astype(jnp.bfloat16))
    bias_padded = jnp.full((1, lane_pad), _NEG_BIG, dtype=jnp.float32)
    bias_padded = bias_padded.at[0, :out_dim].set(bias.astype(jnp.float32))
    return wt_padded, bias_padded, out_dim


def _choose_batch_tile(b, tile_b=None):
    """Pick (tile_rows, num_tiles): >=2 tiles when B allows (v7x megacore +
    pipelining), tile ~= ceil(B/num_tiles) so edge padding is a few rows at most."""
    if tile_b is None:
        tile_b = 2048 if b >= 8192 else 1024
    b_r = _round_up(max(b, 1), _SUBLANE)
    if b_r <= 2 * _SUBLANE:
        return b_r, 1                      # too small to split usefully
    num_tiles = max(2, _ceil_div(b_r, tile_b))
    tb = _round_up(_ceil_div(b_r, num_tiles), _SUBLANE)
    num_tiles = _ceil_div(b_r, tb)
    return tb, num_tiles


def linear_model_forward(x, wt_padded, bias_padded, out_dim, *, tile_b=None):
    """Forward pass of LinearModel.

    x:           (B, 1, 28, 28) or (B, in_dim) float32
    wt_padded:   (in_dim, LANE_PAD) bf16 from prepare_linear_params
    bias_padded: (1, LANE_PAD) f32      from prepare_linear_params
    returns      (B, out_dim) float32 softmax probabilities
    """
    b = x.shape[0]
    # x.view(x.size(0), -1); cast to bf16 so the dominant HBM read (the x DMA
    # into the kernel) is half-width. Accumulation stays f32 inside the kernel.
    x_flat = x.reshape(b, -1).astype(jnp.bfloat16)
    in_dim = x_flat.shape[1]
    lane_pad = wt_padded.shape[1]

    tb, num_tiles = _choose_batch_tile(b, tile_b)
    b_pad = num_tiles * tb
    if b_pad != b:
        # Tile was chosen ~= ceil(B/num_tiles), so this pads at most a few rows
        # (not a near-full tile). Padded rows are all-zero -> logits == bias ->
        # valid softmax rows that are sliced off below.
        x_flat = jnp.pad(x_flat, ((0, b_pad - b), (0, 0)))

    out = pl.pallas_call(
        linear_softmax_kernel,
        out_shape=jax.ShapeDtypeStruct((b_pad, lane_pad), jnp.float32),
        grid_spec=pltpu.PrefetchScalarGridSpec(
            num_scalar_prefetch=0,
            grid=(num_tiles,),
            in_specs=[
                pl.BlockSpec((tb, in_dim), lambda i: (i, 0)),        # pipelined x tiles
                pl.BlockSpec((in_dim, lane_pad), lambda i: (0, 0)),  # resident weight
                pl.BlockSpec((1, lane_pad), lambda i: (0, 0)),       # resident bias
            ],
            out_specs=pl.BlockSpec((tb, lane_pad), lambda i: (i, 0)),
        ),
        compiler_params=pltpu.CompilerParams(
            # Independent batch tiles -> megacore-shardable on v7x.
            dimension_semantics=("parallel",),
        ),
    )(x_flat, wt_padded, bias_padded)

    # NOTE: a consumer that can work with the padded (b_pad, 128) buffer should
    # take `out` directly and fuse its own slice; this materialized slice is
    # kept only to match the module's (B, 10) contract.
    return out[:b, :out_dim]


if __name__ == "__main__":
    key = jax.random.PRNGKey(0)
    k_x, k_w, k_b = jax.random.split(key, 3)

    batch = 8
    input_dim = 784   # 1 * 28 * 28
    output_dim = 10

    # Deterministic parameter init (PyTorch nn.Linear default: U(-1/sqrt(fan_in), +1/sqrt(fan_in)))
    bound = 1.0 / jnp.sqrt(jnp.float32(input_dim))
    weight = jax.random.uniform(
        k_w, (output_dim, input_dim), minval=-bound, maxval=bound, dtype=jnp.float32
    )
    bias = jax.random.uniform(
        k_b, (output_dim,), minval=-bound, maxval=bound, dtype=jnp.float32
    )

    # One-time parameter prep (transpose + lane padding + bf16 cast), outside hot path.
    wt_padded, bias_padded, out_dim = prepare_linear_params(weight, bias)

    # Example input: MNIST-like NCHW batch.
    x = jax.random.normal(k_x, (batch, 1, 28, 28), dtype=jnp.float32)
    probs = jax.block_until_ready(
        linear_model_forward(x, wt_padded, bias_padded, out_dim)
    )

    # Pure-JAX f32 reference (bf16 matmul + approx reciprocal -> a few e-3 slack).
    ref = jax.nn.softmax(x.reshape(batch, -1) @ weight.T + bias, axis=1)
    assert probs.shape == (batch, output_dim)
    assert jnp.allclose(jnp.sum(probs, axis=1), 1.0, atol=3e-3)
    assert jnp.allclose(probs, ref, atol=5e-3)

    # Tail-padding path (batch not a multiple of the sublane).
    x_odd = jax.random.normal(k_x, (5, 1, 28, 28), dtype=jnp.float32)
    probs_odd = jax.block_until_ready(
        linear_model_forward(x_odd, wt_padded, bias_padded, out_dim)
    )
    ref_odd = jax.nn.softmax(x_odd.reshape(5, -1) @ weight.T + bias, axis=1)
    assert probs_odd.shape == (5, output_dim)
    assert jnp.allclose(probs_odd, ref_odd, atol=5e-3)

    # Multi-tile path (grid > 1) exercised at small shapes via a tiny tile_b.
    x_multi = jax.random.normal(k_x, (40, 1, 28, 28), dtype=jnp.float32)
    probs_multi = jax.block_until_ready(
        linear_model_forward(x_multi, wt_padded, bias_padded, out_dim, tile_b=16)
    )
    ref_multi = jax.nn.softmax(x_multi.reshape(40, -1) @ weight.T + bias, axis=1)
    assert probs_multi.shape == (40, output_dim)
    assert jnp.allclose(probs_multi, ref_multi, atol=5e-3)

    print("KERNEL_OK")
</pallas_src>

<mosaic_0001>
module attributes {stable_mosaic.version = 11 : i64} {
  func.func @linear_softmax_kernel(%arg0: i32, %arg1: memref<16x784xbf16, #tpu.memory_space<vmem>>, %arg2: memref<784x128xbf16, #tpu.memory_space<vmem>>, %arg3: memref<1x128xf32, #tpu.memory_space<vmem>>, %arg4: memref<16x128xf32, #tpu.memory_space<vmem>>) attributes {dimension_semantics = [#tpu.dimension_semantics<parallel>], iteration_bounds = array<i64: 1>, scalar_prefetch = 0 : i64, scratch_operands = 0 : i64, tpu.core_type = #tpu.core_type<tc>, window_params = [{transform_indices = @transform_0, window_bounds = array<i64: 16, 784>}, {pipeline_mode = #tpu.pipeline_mode<synchronous>, transform_indices = @transform_1, window_bounds = array<i64: 784, 128>}, {pipeline_mode = #tpu.pipeline_mode<synchronous>, transform_indices = @transform_2, window_bounds = array<i64: 1, 128>}, {transform_indices = @transform_3, window_bounds = array<i64: 16, 128>}]} {
    %c0 = arith.constant 0 : index
    %c0_0 = arith.constant 0 : index
    %0 = vector.load %arg1[%c0, %c0_0] : memref<16x784xbf16, #tpu.memory_space<vmem>>, vector<16x784xbf16>
    %c0_1 = arith.constant 0 : index
    %c0_2 = arith.constant 0 : index
    %1 = vector.load %arg2[%c0_1, %c0_2] : memref<784x128xbf16, #tpu.memory_space<vmem>>, vector<784x128xbf16>
    %cst = arith.constant dense<0.000000e+00> : vector<16x128xf32>
    %2 = tpu.matmul %0, %1, %cst {dimension_numbers = #tpu.dot_dimension_numbers<[1], [0], [0], [1], [0, 0, 1, 1], [], []>} : vector<16x784xbf16>, vector<784x128xbf16>, vector<16x128xf32> -> vector<16x128xf32>
    %c0_3 = arith.constant 0 : index
    %c0_4 = arith.constant 0 : index
    %3 = vector.load %arg3[%c0_3, %c0_4] : memref<1x128xf32, #tpu.memory_space<vmem>>, vector<1x128xf32>
    %4 = vector.broadcast %3 : vector<1x128xf32> to vector<16x128xf32>
    %5 = arith.addf %2, %4 : vector<16x128xf32>
    %cst_5 = arith.constant dense<0xFF800000> : vector<16xf32>
    %6 = vector.multi_reduction <maximumf>, %5, %cst_5 [1] : vector<16x128xf32> to vector<16xf32>
    %7 = vector.shape_cast %6 : vector<16xf32> to vector<16x1xf32>
    %8 = vector.broadcast %7 : vector<16x1xf32> to vector<16x128xf32>
    %9 = arith.subf %5, %8 : vector<16x128xf32>
    %10 = math.exp %9 : vector<16x128xf32>
    %cst_6 = arith.constant dense<0.000000e+00> : vector<16xf32>
    %11 = vector.multi_reduction <add>, %10, %cst_6 [1] : vector<16x128xf32> to vector<16xf32>
    %12 = vector.shape_cast %11 : vector<16xf32> to vector<16x1xf32>
    %13 = tpu.reciprocal %12 {approx = true} : vector<16x1xf32> -> vector<16x1xf32>
    %14 = vector.broadcast %13 : vector<16x1xf32> to vector<16x128xf32>
    %15 = arith.mulf %10, %14 : vector<16x128xf32>
    %c0_7 = arith.constant 0 : index
    %c0_8 = arith.constant 0 : index
    %16 = vector.load %arg4[%c0_7, %c0_8] : memref<16x128xf32, #tpu.memory_space<vmem>>, vector<16x128xf32>
    tpu.vector_store %arg4[%c0_7, %c0_8], %15 {strides = array<i32>} : memref<16x128xf32, #tpu.memory_space<vmem>>, vector<16x128xf32>,
    return
  }
  func.func @transform_0(%arg0: i32) -> (i32, i32) {
    %c0_i32 = arith.constant 0 : i32
    %c0_i32_0 = arith.constant 0 : i32
    return %arg0, %c0_i32 : i32, i32
  }
  func.func @transform_1(%arg0: i32) -> (i32, i32) {
    %c0_i32 = arith.constant 0 : i32
    %c0_i32_0 = arith.constant 0 : i32
    %c0_i32_1 = arith.constant 0 : i32
    return %c0_i32, %c0_i32_0 : i32, i32
  }
  func.func @transform_2(%arg0: i32) -> (i32, i32) {
    %c0_i32 = arith.constant 0 : i32
    %c0_i32_0 = arith.constant 0 : i32
    %c0_i32_1 = arith.constant 0 : i32
    return %c0_i32, %c0_i32_0 : i32, i32
  }
  func.func @transform_3(%arg0: i32) -> (i32, i32) {
    %c0_i32 = arith.constant 0 : i32
    %c0_i32_0 = arith.constant 0 : i32
    return %arg0, %c0_i32 : i32, i32
  }
}

</mosaic_0001>

<bundles_post_ra>
// kernel: tpu_custom_call.1
= control target key start
LH: loop header
LB: loop body
LE: loop exit
PB: predicated region body
PF: predicated region fallthrough
CT: control target
= control target key end

     0   :  { %8 = vsyncpa [#allocation3], 0  ;;  %s1044_s0 = inlined_call_operand.hbm [shape: bf16[16,784], index: 0, kind: input, shape index: {}]   ;;  %s1045_s1 = inlined_call_operand.hbm [shape: bf16[784,128], index: 1, kind: input, shape index: {}]   ;;  %s1046_s2 = inlined_call_operand.vmem [shape: f32[1,128], index: 2, kind: input, shape index: {}]   ;;  %s1047_s3 = inlined_call_operand.hbm [shape: f32[16,128], index: 3, kind: output, shape index: {}]  }
   0x1   :  { %9 = vsyncpa [#allocation6], 0 }
   0x2   :  { %10 = vsyncpa [#allocation4], 0  ;;  %s974_s12 = smov [#allocation2]   ;;  %s902_s16 = scalar_lea.hbm %s1044_s0, 896 }
   0x3   :  { %s16_s13 = sshll.u32 %s974_s12, 4  ;;  %p903_p0 = scmp.ne.s32.totalorder %s1044_s0, %s902_s16  ;;  %s17_s13 = int_to_ptr.vmem [resolvable:$true] %s16_s13 }
   0x4   :  { %p906_p1 = scmp.lt.u32.totalorder %s902_s16, %s1044_s0 }
   0x6   :  { %p908_p2 = pnand %p906_p1, %p903_p0 }
   0x8   :  { %911 = shalt.err (!%p908_p2)
}
   0x9   :  { %s912_s21 = scalar_lea.vmem %s17_s13, 896  ;;  %p917_p4 = scmp.lt.s32.totalorder %s17_s13, %s17_s13 }
   0xa   :  { %p913_p3 = scmp.ne.s32.totalorder %s17_s13, %s912_s21  ;;  %p918_p5 = scmp.lt.s32.totalorder %s912_s21, %s912_s21 }
   0xc   :  { %p919_p6 = por %p918_p5, %p917_p4 }
   0xe   :  { %p920_p7 = pnand %p919_p6, %p913_p3 }
  0x10   :  { %923 = shalt.err (!%p920_p7)
}
  0x11   :  { %s975_s22 = smov 448   ;;  %s976_s23 = smov 28  }
  0x12   :  { %22 = dma.hbm_to_vmem [thread:$0]  %s1044_s0, 896, %s17_s13, [#allocation3], %s975_s22, %s975_s22, %s976_s23  }
  0x13   :  { %s977_s26 = smov [#allocation5]   ;;  %s924_s30 = scalar_lea.hbm %s1045_s1, 6272 }
  0x14   :  { %s28_s27 = sshll.u32 %s977_s26, 4  ;;  %p925_p8 = scmp.ne.s32.totalorder %s1045_s1, %s924_s30  ;;  %s29_s27 = int_to_ptr.vmem [resolvable:$true] %s28_s27 }
  0x15   :  { %p928_p9 = scmp.lt.u32.totalorder %s924_s30, %s1045_s1 }
  0x17   :  { %p930_p10 = pnand %p928_p9, %p925_p8 }
  0x19   :  { %933 = shalt.err (!%p930_p10)
}
  0x1a   :  { %s934_s8 = scalar_lea.vmem %s29_s27, 6272  ;;  %p939_p12 = scmp.lt.s32.totalorder %s29_s27, %s29_s27 }
  0x1b   :  { %p935_p11 = scmp.ne.s32.totalorder %s29_s27, %s934_s8  ;;  %p940_p13 = scmp.lt.s32.totalorder %s934_s8, %s934_s8 }
  0x1d   :  { %p941_p0 = por %p940_p13, %p939_p12 }
  0x1f   :  { %p942_p1 = pnand %p941_p0, %p935_p11 }
  0x21   :  { %945 = shalt.err (!%p942_p1)
}
  0x22   :  { %s978_s0 = smov 64   ;;  %s979_s9 = smov 4  }
  0x23   :  { %34 = dma.hbm_to_vmem [thread:$0]  %s1045_s1, 6272, %s29_s27, [#allocation6], %s978_s0, %s978_s0, %s979_s9  }
  0x24   :  { %968 = dma.done.wait [#allocation3], 896  }
  0x25   :  { %969 = vsyncadd [#allocation3], 4294966400 }
  0x26   :  { %970 = dma.done.wait [#allocation6], 6272  }
  0x27   :  { %971 = vsyncadd [#allocation6], 4294961024  ;;  %v835_v0 = vld [vmem:[#allocation5 + $0x40] sm:$0xff]   ;;  %v839_v4 = vld [vmem:[#allocation5 + $0x48] sm:$0xff]   ;;  %v980_v38 = vmov 0.0   ;;  %vm981_vm0 = vmmov 0  }
  0x28   :  { %v836_v1 = vld [vmem:[#allocation5] sm:$0xff]   ;;  %750 = vmatprep.subr.bf16.mxu0 %v835_v0  ;;  %v840_v5 = vld [vmem:[#allocation5 + $0x8] sm:$0xff]   ;;  %v843_v8 = vld [vmem:[#allocation5 + $0x50] sm:$0xff]   ;;  %vm486_vm1 = vcmask 130048  }
  0x29   :  { %v837_v2 = vld [vmem:[#allocation5 + $0xc0] sm:$0xff]   ;;  %751 = vmatpush3.bf16.msra.mxu0 %v836_v1  ;;  %v841_v6 = vld [vmem:[#allocation5 + $0xc8] sm:$0xff]   ;;  %v844_v9 = vld [vmem:[#allocation5 + $0x10] sm:$0xff]  }
  0x2a   :  { %v838_v3 = vld [vmem:[#allocation5 + $0x80] sm:$0xff]   ;;  %772 = vmatprep.subr.bf16.mxu1 %v837_v2  ;;  %752 = vmatprep.subr.bf16.mxu0 %v839_v4  ;;  %v842_v7 = vld [vmem:[#allocation5 + $0x88] sm:$0xff]   ;;  %v845_v10 = vld [vmem:[#allocation5 + $0xd0] sm:$0xff]  }
  0x2b   :  { %773 = vmatpush3.bf16.msra.mxu1 %v838_v3  ;;  %v846_v11 = vld [vmem:[#allocation5 + $0x90] sm:$0xff]   ;;  %v847_v12 = vld [vmem:[#allocation5 + $0x58] sm:$0xff]   ;;  %v851_v16 = vld [vmem:[#allocation5 + $0x60] sm:$0xff]  }
  0x2c   :  { %774 = vmatprep.subr.bf16.mxu1 %v841_v6  ;;  %v848_v13 = vld [vmem:[#allocation5 + $0x18] sm:$0xff]   ;;  %v852_v17 = vld [vmem:[#allocation5 + $0x20] sm:$0xff]   ;;  %v855_v20 = vld [vmem:[#allocation5 + $0x68] sm:$0xff]  }
  0x2d   :  { %753 = vmatpush3.bf16.msra.mxu0 %v840_v5  ;;  %v849_v14 = vld [vmem:[#allocation5 + $0xd8] sm:$0xff]   ;;  %v853_v18 = vld [vmem:[#allocation5 + $0xe0] sm:$0xff]   ;;  %v856_v21 = vld [vmem:[#allocation5 + $0x28] sm:$0xff]  }
  0x2e   :  { %754 = vmatprep.subr.bf16.mxu0 %v843_v8  ;;  %v850_v15 = vld [vmem:[#allocation5 + $0x98] sm:$0xff]   ;;  %v854_v19 = vld [vmem:[#allocation5 + $0xa0] sm:$0xff]   ;;  %v857_v22 = vld [vmem:[#allocation5 + $0xe8] sm:$0xff]  }
  0x2f   :  { %775 = vmatpush3.bf16.msra.mxu1 %v842_v7  ;;  %v858_v23 = vld [vmem:[#allocation5 + $0xa8] sm:$0xff]   ;;  %v859_v24 = vld [vmem:[#allocation5 + $0x70] sm:$0xff]   ;;  %v863_v28 = vld [vmem:[#allocation5 + $0x78] sm:$0xff]  }
  0x30   :  { %776 = vmatprep.subr.bf16.mxu1 %v845_v10  ;;  %v860_v25 = vld [vmem:[#allocation5 + $0x30] sm:$0xff]   ;;  %v864_v29 = vld [vmem:[#allocation5 + $0x38] sm:$0xff]   ;;  %v866_v31 = vld [vmem:[#allocation2] ss:$28 sps:$4 sm:$0xff]  }
  0x31   :  { %755 = vmatpush3.bf16.msra.mxu0 %v844_v9  ;;  %v861_v26 = vld [vmem:[#allocation5 + $0xf0] sm:$0xff]   ;;  %v865_v30 = vld [vmem:[#allocation5 + $0xf8] sm:$0xff]   ;;  %v868_v32 = vld [vmem:[#allocation2 + $0x4] ss:$28 sps:$4 sm:$0xff]  }
  0x32   :  { %756 = vmatprep.subr.bf16.mxu0 %v847_v12  ;;  %v862_v27 = vld [vmem:[#allocation5 + $0xb0] sm:$0xff]   ;;  %v869_v33 = vld [vmem:[#allocation5 + $0xb8] sm:$0xff]   ;;  %522 = vmatprep.mubr.bf16.mxu0 %v868_v32  ;;  %v870_v34 = vld [vmem:[#allocation5 + $0x140] sm:$0xff]  }
  0x33   :  { %777 = vmatpush3.bf16.msra.mxu1 %v846_v11  ;;  %v871_v35 = vld [vmem:[#allocation2 + $0x8] ss:$28 sps:$4 sm:$0xff]   ;;  %v874_v37 = vld [vmem:[#allocation5 + $0x100] sm:$0xff]   ;;  %v879_v43 = vld [vmem:[#allocation5 + $0x158] sm:$0xff]  }
  0x34   :  { %778 = vmatprep.subr.bf16.mxu1 %v849_v14  ;;  %v873_v36 = vld [vmem:[#allocation2 + $0xc] ss:$28 sps:$4 sm:$0xff]   ;;  %v875_v39 = vld [vmem:[#allocation5 + $0x148] sm:$0xff]   ;;  %v880_v44 = vld [vmem:[#allocation5 + $0x118] sm:$0xff]  }
  0x35   :  { %757 = vmatpush3.bf16.msra.mxu0 %v848_v13  ;;  %563 = vmatprep.mubr.bf16.mxu1 %v873_v36  ;;  %v876_v40 = vld [vmem:[#allocation5 + $0x108] sm:$0xff]   ;;  %v877_v41 = vld [vmem:[#allocation5 + $0x150] sm:$0xff]   ;;  %v881_v45 = vld [vmem:[#allocation5 + $0x160] sm:$0xff]  }
  0x36   :  { %758 = vmatprep.subr.bf16.mxu0 %v851_v16  ;;  %v878_v42 = vld [vmem:[#allocation5 + $0x110] sm:$0xff]   ;;  %v882_v46 = vld [vmem:[#allocation5 + $0x120] sm:$0xff]   ;;  %v883_v47 = vld [vmem:[#allocation5 + $0x168] sm:$0xff]  }
  0x37   :  { %779 = vmatpush3.bf16.msra.mxu1 %v850_v15  ;;  %v889_v48 = vld [vmem:[#allocation5 + $0x180] sm:$0xff]   ;;  %v892_v49 = vld [vmem:[#allocation2 + $0x14] ss:$28 sps:$4 sm:$0xff]   ;;  %v884_v51 = vld [vmem:[#allocation5 + $0x128] sm:$0xff]  }
  0x38   :  { %780 = vmatprep.subr.bf16.mxu1 %v853_v18  ;;  %v893_v50 = vld [vmem:[#allocation2 + $0x18] ss:$28 sps:$4 sm:$0xff]   ;;  %v885_v52 = vld [vmem:[#allocation5 + $0x170] sm:$0xff]   ;;  %v692_v58 = vld [vmem:[%s1046_s2] ss:$0 sm:$0xff]  ;;  %s982_s2 = smov [#allocation7]  }
  0x39   :  { %759 = vmatpush3.bf16.msra.mxu0 %v852_v17  ;;  %v886_v53 = vld [vmem:[#allocation5 + $0x130] sm:$0xff]   ;;  %v887_v54 = vld [vmem:[#allocation5 + $0x178] sm:$0xff]   ;;  %s679_s13 = sshll.u32 %s982_s2, 4  ;;  %s680_s13 = int_to_ptr.vmem [resolvable:$true] %s679_s13 }
  0x3a   :  { %760 = vmatprep.subr.bf16.mxu0 %v855_v20  ;;  %v888_v55 = vld [vmem:[#allocation5 + $0x138] sm:$0xff]   ;;  %s946_s14 = scalar_lea.vmem %s680_s13, 256  ;;  %p951_p3 = scmp.lt.s32.totalorder %s680_s13, %s680_s13 }
  0x3b   :  { %781 = vmatpush3.bf16.msra.mxu1 %v854_v19  ;;  %v890_v56 = vld [vmem:[#allocation2 + $0x10] ss:$28 sps:$4 sm:$0xff]   ;;  %p947_p2 = scmp.ne.s32.totalorder %s680_s13, %s946_s14  ;;  %p952_p4 = scmp.lt.s32.totalorder %s946_s14, %s946_s14 }
  0x3c   :  { %782 = vmatprep.subr.bf16.mxu1 %v857_v22 }
  0x3d   :  { %761 = vmatpush3.bf16.msra.mxu0 %v856_v21  ;;  %p953_p5 = por %p952_p4, %p951_p3 }
  0x3e   :  { %762 = vmatprep.subr.bf16.mxu0 %v859_v24 }
  0x3f   :  { %783 = vmatpush3.bf16.msra.mxu1 %v858_v23  ;;  %p954_p6 = pnand %p953_p5, %p947_p2 }
  0x40   :  { %784 = vmatprep.subr.bf16.mxu1 %v861_v26 }
  0x41   :  { %763 = vmatpush3.bf16.msra.mxu0 %v860_v25 }
  0x42   :  { %764 = vmatprep.subr.bf16.mxu0 %v863_v28 }
  0x43   :  { %785 = vmatpush3.bf16.msra.mxu1 %v862_v27 }
  0x44   :  { %786 = vmatprep.subr.bf16.mxu1 %v865_v30 }
  0x45   :  { %765 = vmatpush3.bf16.msra.mxu0 %v864_v29 }
  0x46   :  { %794 = vmatprep.subr.bf16.mxu0 %v870_v34 }
  0x47   :  { %787 = vmatpush3.bf16.msra.mxu1 %v869_v33 }
  0x48   :  { %523 = vmatmul.mubr.bf16.vlgmr.msra.gmra.mrb[0].mxu0 %v866_v31  ;;  %818 = vmatprep.subr.bf16.mxu1 %v980_v38 }
  0x49   :  { %795 = vmatpush3.bf16.msra.mxu0 %v874_v37  ;;  %604 = vmatprep.mubr.bf16.mxu0 %v892_v49 }
  0x4a   :  { %564 = vmatmul.mubr.bf16.vlgmr.msra.gmra.mrb[0].mxu1 %v871_v35  ;;  %796 = vmatprep.subr.bf16.mxu0 %v875_v39 }
  0x4b   :  { %820 = vmatprep.mubr.msk.bf16.mxu1 %vm981_vm0, %v980_v38  ;;  %819 = vmatpush3.bf16.msra.mxu1 %v889_v48 }
  0x4d   :  { %797 = vmatpush3.bf16.msra.mxu0 %v876_v40 }
  0x4e   :  { %798 = vmatprep.subr.bf16.mxu0 %v877_v41 }
  0x51   :  { %799 = vmatpush3.bf16.msra.mxu0 %v878_v42 }
  0x52   :  { %800 = vmatprep.subr.bf16.mxu0 %v879_v43  ;;  %821 = vmatmul.mubr.msk.bf16.vlgmr.msra.gmra.mrb[4].mxu1 %vm486_vm1, %v893_v50 }
  0x55   :  { %801 = vmatpush3.bf16.msra.mxu0 %v880_v44 }
  0x56   :  { %802 = vmatprep.subr.bf16.mxu0 %v881_v45 }
  0x59   :  { %803 = vmatpush3.bf16.msra.mxu0 %v882_v46 }
  0x5a   :  { %804 = vmatprep.subr.bf16.mxu0 %v883_v47 }
  0x5d   :  { %805 = vmatpush3.bf16.msra.mxu0 %v884_v51 }
  0x5e   :  { %806 = vmatprep.subr.bf16.mxu0 %v885_v52 }
  0x61   :  { %807 = vmatpush3.bf16.msra.mxu0 %v886_v53 }
  0x62   :  { %808 = vmatprep.subr.bf16.mxu0 %v887_v54 }
  0x65   :  { %809 = vmatpush3.bf16.msra.mxu0 %v888_v55 }
  0x68   :  { %605 = vmatmul.mubr.bf16.vlgmr.msra.gmra.mrb[4].mxu0 %v890_v56 }
 0x11b   :  { %v766_v57 = vpop.f32.mrb[0].mxu0 }
 0x11c   :  { %v767_v59 = vpop.f32.mrb[1].mxu0 }
 0x11d   :  { %v768_v60 = vadd.f32 %v767_v59, %v766_v57  ;;  %v769_v61 = vpop.f32.mrb[2].mxu0  ;;  %v788_v62 = vpop.f32.mrb[0].mxu1 }
 0x11e   :  { %v770_v63 = vpop.f32.mrb[3].mxu0  ;;  %v789_v2 = vpop.f32.mrb[1].mxu1 }
 0x11f   :  { %v525_v0 = vadd.f32 %v768_v60, %v692_v58  ;;  %v771_v1 = vadd.f32 %v770_v63, %v769_v61  ;;  %v790_v3 = vadd.f32 %v789_v2, %v788_v62  ;;  %v791_v4 = vpop.f32.mrb[2].mxu1 }
 0x120   :  { %v792_v6 = vpop.f32.mrb[3].mxu1 }
 0x121   :  { %v528_v5 = vadd.f32 %v771_v1, %v692_v58  ;;  %v566_v7 = vadd.f32 %v790_v3, %v525_v0  ;;  %v793_v8 = vadd.f32 %v792_v6, %v791_v4 }
 0x123   :  { %v569_v9 = vadd.f32 %v793_v8, %v528_v5 }
 0x125   :  { %v647_v10 = vpop.f32.mrb[4].mxu1 }
 0x126   :  { %v822_v11 = vpop.f32.mrb[5].mxu1 }
 0x127   :  { %v650_v12 = vpop.f32.mrb[6].mxu1 }
 0x128   :  { %v823_v13 = vpop.f32.mrb[7].mxu1 }
 0x13b   :  { %v810_v14 = vpop.f32.mrb[4].mxu0 }
 0x13c   :  { %v811_v15 = vpop.f32.mrb[5].mxu0 }
 0x13d   :  { %v812_v16 = vadd.f32 %v811_v15, %v810_v14  ;;  %v813_v17 = vpop.f32.mrb[6].mxu0 }
 0x13e   :  { %v814_v18 = vpop.f32.mrb[7].mxu0 }
 0x13f   :  { %v607_v19 = vadd.f32 %v812_v16, %v566_v7  ;;  %v815_v20 = vadd.f32 %v814_v18, %v813_v17 }
 0x141   :  { %v648_v21 = vadd.f32 %v647_v10, %v607_v19  ;;  %v610_v22 = vadd.f32 %v815_v20, %v569_v9 }
 0x143   :  { %v651_v23 = vadd.f32 %v650_v12, %v610_v22  ;;  %654 = vmax.xlane.f32.xlu0 %v648_v21 }
 0x147   :  { %656 = vmax.xlane.f32.xlu0 %v651_v23 }
 0x1d0   :  { %v655_v24 = vpop.xlane.xlu0 %654 }
 0x1d1   :  { %v658_v25 = vsub.f32 %v648_v21, %v655_v24 }
 0x1d3   :  { %v660_v26 = vmul.f32 1.442695, %v658_v25 }
 0x1d4   :  { %v657_v27 = vpop.xlane.xlu0 %656 }
 0x1d5   :  { %894 = vpow2.f32 %v660_v26  ;;  %v659_v28 = vsub.f32 %v651_v23, %v657_v27 }
 0x1d7   :  { %v662_v29 = vmul.f32 1.442695, %v659_v28 }
 0x1d9   :  { %896 = vpow2.f32 %v662_v29 }
 0x1df   :  { %v895_v30 = vpop.eup %894 }
 0x1e0   :  { %664 = vadd.xlane.f32.xlu1 %v895_v30 }
 0x1e3   :  { %v897_v31 = vpop.eup %896 }
 0x1e4   :  { %666 = vadd.xlane.f32.xlu1 %v897_v31 }
 0x26d   :  { %v665_v32 = vpop.xlane.xlu1 %664 }
 0x26e   :  { %898 = vrcp.f32 %v665_v32 }
 0x271   :  { %v667_v33 = vpop.xlane.xlu1 %666 }
 0x272   :  { %900 = vrcp.f32 %v667_v33 }
 0x278   :  { %v899_v34 = vpop.eup %898 }
 0x279   :  { %v670_v35 = vmul.f32 %v899_v34, %v895_v30 }
 0x27b   :  { %672 = vst [vmem:[#allocation7] sm:$0xff] %v670_v35 }
 0x27c   :  { %v901_v36 = vpop.eup %900 }
 0x27d   :  { %v671_v37 = vmul.f32 %v901_v36, %v897_v31 }
 0x27f   :  { %673 = vst [vmem:[#allocation7 + $0x8] sm:$0xff] %v671_v37 }
 0x280   :  { %957 = shalt.err (!%p954_p6)
}
 0x281   :  { %s958_s17 = scalar_lea.hbm %s1047_s3, 256 }
 0x282   :  { %p959_p7 = scmp.ne.s32.totalorder %s1047_s3, %s958_s17  ;;  %p962_p8 = scmp.lt.u32.totalorder %s958_s17, %s1047_s3 }
 0x284   :  { %p964_p9 = pnand %p962_p8, %p959_p7 }
 0x286   :  { %967 = shalt.err (!%p964_p9)
}
 0x287   :  { %s983_s22 = smov 128   ;;  %s984_s23 = smov 8  }
 0x288   :  { %685 = dma.vmem_to_hbm [thread:$0]  %s680_s13, 256, %s1047_s3, [#allocation4], %s983_s22, %s983_s22, %s984_s23  }
 0x289   :  { %972 = dma.done.wait [#allocation4], 256  }
 0x28a   :  { %973 = vsyncadd [#allocation4], 4294967040 }
 0x28b   :  { %689 = vsyncpa [#allocation3], 1 }
 0x28c   :  { %690 = vsyncpa [#allocation6], 1 }
 0x28d   :  { %691 = vsyncpa [#allocation4], 1 }

</bundles_post_ra>
